<compile_context>
chip_gen: v5e
topology: v5e:2x2
jax: 0.10.0
libtpu: 0.0.40
codegen_flags: <defaults>
</compile_context>

<pallas_src>
import functools

import jax
import jax.numpy as jnp
from jax.experimental import pallas as pl
from jax.experimental.pallas import tpu as pltpu

_LANES = 128


def _cdiv(a, b):
    return (a + b - 1) // b


def _bin_loss_kernel(outs_ref, tgt_ref, tres_ref, loss_ref, valid_ref,
                     acc_loss, acc_valid, *,
                     num_classes, num_rows, tile_r, need_row_mask):
    j = pl.program_id(1)

    @pl.when(j == 0)
    def _():
        acc_loss[...] = jnp.zeros_like(acc_loss)
        acc_valid[...] = jnp.zeros_like(acc_valid)

    tgt = tgt_ref[0, 0]                                   # (TR, 128) int32
    tres = tres_ref[0, 0].astype(jnp.float32)             # (TR, 128)

    valid = tgt >= 0
    if need_row_mask:
        # Only compiled for images whose row count is not a multiple of TR.
        row = j * tile_r + jax.lax.broadcasted_iota(jnp.int32, tgt.shape, 0)
        valid = valid & (row < num_rows)
    idx = jnp.where(valid, tgt, 0)                        # target * val.long()

    # --- class work as unrolled elementwise plane loops (pure VPU/EUP) -----
    # Pass 1: running max over the C bin-cls planes (stable logsumexp).
    m = outs_ref[0, 0].astype(jnp.float32)
    for c in range(1, num_classes):
        m = jnp.maximum(m, outs_ref[0, c].astype(jnp.float32))

    # Pass 2: sum(exp), select-gather of the target logit and target residual.
    sumexp = jnp.zeros_like(m)
    logit_t = jnp.zeros_like(m)
    gathered = jnp.zeros_like(m)
    for c in range(num_classes):
        logits_c = outs_ref[0, c].astype(jnp.float32)
        sumexp = sumexp + jnp.exp(logits_c - m)
        hit = idx == c
        logit_t = jnp.where(hit, logits_c, logit_t)
        gathered = jnp.where(hit,
                             outs_ref[0, num_classes + c].astype(jnp.float32),
                             gathered)

    ce = jnp.where(valid, (m + jnp.log(sumexp)) - logit_t, 0.0)
    resid = jnp.where(valid, gathered - tres, 0.0)

    # Merged accumulator: ce + 10 * resid^2 (both normalize by the same count).
    acc_loss[...] = acc_loss[...] + (ce + 10.0 * resid * resid)
    acc_valid[...] = acc_valid[...] + valid.astype(jnp.float32)

    @pl.when(j == pl.num_programs(1) - 1)
    def _():
        loss_ref[...] = jnp.sum(acc_loss[...], keepdims=True).reshape(1, 1, 1)
        valid_ref[...] = jnp.sum(acc_valid[...], keepdims=True).reshape(1, 1, 1)


def _derive_row_tile(rows, c2, out_bytes, tres_bytes, budget_bytes):
    """Rows of 128 pixels per step, sized against a VMEM budget."""
    per_row = _LANES * (2 * c2 * out_bytes      # fused cls+res block, 2 buffers
                        + 2 * 4                 # int32 targets, 2 buffers
                        + 2 * tres_bytes        # residual targets, 2 buffers
                        + 2 * 4)                # two f32 accumulators
    tr = budget_bytes // per_row
    if tr >= rows:
        return rows                             # full-dim block (always legal)
    return max((tr // 8) * 8, 8)                # multiple of 8 sublanes


@functools.partial(jax.jit, static_argnames=("vmem_budget_bytes",))
def bin_loss(outputs, target_bin_cls, target_res_reg,
             vmem_budget_bytes=8 * 1024 * 1024):
    """outputs: (N, 2C, H, W); target_bin_cls: (N, H, W) int;
    target_res_reg: (N, 1, H, W)."""
    N, C2, H, W = outputs.shape
    C = C2 // 2
    HW = H * W

    # Free reshapes (contiguous) — no transpose, no dtype widening in HBM.
    outs = outputs.reshape(N, C2, HW)
    tgt = target_bin_cls.reshape(N, 1, HW).astype(jnp.int32)
    tres = target_res_reg.reshape(N, 1, HW)

    rows = _cdiv(HW, _LANES)
    pad = rows * _LANES - HW
    if pad:
        # One extra HBM pass only for lane-unaligned images; padded pixels get
        # target = -1 so they are simply invalid inside the kernel.
        outs = jnp.pad(outs, ((0, 0), (0, 0), (0, pad)))
        tgt = jnp.pad(tgt, ((0, 0), (0, 0), (0, pad)), constant_values=-1)
        tres = jnp.pad(tres, ((0, 0), (0, 0), (0, pad)))

    outs = outs.reshape(N, C2, rows, _LANES)
    tgt = tgt.reshape(N, 1, rows, _LANES)
    tres = tres.reshape(N, 1, rows, _LANES)

    tr = _derive_row_tile(rows, C2, outs.dtype.itemsize, tres.dtype.itemsize,
                          vmem_budget_bytes)
    n_tiles = _cdiv(rows, tr)
    need_row_mask = (rows % tr) != 0

    kernel = functools.partial(
        _bin_loss_kernel, num_classes=C, num_rows=rows, tile_r=tr,
        need_row_mask=need_row_mask)

    # TODO(synk): when N == 1, also split the pixel-tile axis into per-core
    # chunks (with per-chunk partial outputs) so v7x megacore stays fully used.
    loss_sums, valid_counts = pl.pallas_call(
        kernel,
        out_shape=(jax.ShapeDtypeStruct((N, 1, 1), jnp.float32),
                   jax.ShapeDtypeStruct((N, 1, 1), jnp.float32)),
        grid_spec=pltpu.PrefetchScalarGridSpec(
            num_scalar_prefetch=0,
            grid=(N, n_tiles),
            in_specs=[
                # fused cls+res stream: one block, one DMA stream per step
                pl.BlockSpec((1, C2, tr, _LANES), lambda n, j: (n, 0, j, 0)),
                pl.BlockSpec((1, 1, tr, _LANES), lambda n, j: (n, 0, j, 0)),
                pl.BlockSpec((1, 1, tr, _LANES), lambda n, j: (n, 0, j, 0)),
            ],
            out_specs=[
                pl.BlockSpec((1, 1, 1), lambda n, j: (n, 0, 0)),
                pl.BlockSpec((1, 1, 1), lambda n, j: (n, 0, 0)),
            ],
            scratch_shapes=[
                pltpu.VMEM((tr, _LANES), jnp.float32),  # merged loss partials
                pltpu.VMEM((tr, _LANES), jnp.float32),  # valid-pixel counts
            ],
        ),
        compiler_params=pltpu.CompilerParams(
            dimension_semantics=("parallel", "arbitrary")),
    )(outs, tgt, tres)

    n_valid = jnp.sum(valid_counts)
    # NOTE: NaN when no pixel is valid — matches the PyTorch 0/0 semantics.
    return 5.0 * jnp.sum(loss_sums) / n_valid


def _reference(outputs, target_bin_cls, target_res_reg):
    """Pure-JAX reference mirroring the PyTorch forward."""
    N, C2, H, W = outputs.shape
    C = C2 // 2
    cls, res = outputs[:, :C], outputs[:, C:]
    tgt = target_bin_cls.astype(jnp.int32)
    valid = (tgt >= 0)
    valid_f = valid.astype(jnp.float32)
    idx = jnp.where(valid, tgt, 0)

    logp = jax.nn.log_softmax(cls, axis=1)
    picked = jnp.take_along_axis(logp, idx[:, None], axis=1)[:, 0]
    ce = jnp.sum(-picked * valid_f) / jnp.sum(valid_f)

    gathered = jnp.take_along_axis(res, idx[:, None], axis=1)  # (N,1,H,W)
    resid = gathered * valid_f[:, None] - target_res_reg * valid_f[:, None]
    reg = jnp.sum(resid ** 2) / jnp.sum(valid_f)
    return 5.0 * (ce + 10.0 * reg)


if __name__ == "__main__":
    key = jax.random.PRNGKey(0)
    k1, k2, k3 = jax.random.split(key, 3)

    N, C, H, W = 2, 4, 16, 16
    outputs = jax.random.normal(k1, (N, 2 * C, H, W), dtype=jnp.float32)
    # targets in [-1, C): -1 pixels are ignored
    target_bin_cls = jax.random.randint(k2, (N, H, W), -1, C, dtype=jnp.int32)
    target_res_reg = jax.random.normal(k3, (N, 1, H, W), dtype=jnp.float32)

    loss = bin_loss(outputs, target_bin_cls, target_res_reg)
    loss = jax.block_until_ready(loss)

    ref = _reference(outputs, target_bin_cls, target_res_reg)
    assert jnp.allclose(loss, ref, rtol=1e-4, atol=1e-4), (loss, ref)

    print("KERNEL_OK")
</pallas_src>

<mosaic_0001>
module attributes {stable_mosaic.version = 11 : i64} {
  func.func @_bin_loss_kernel(%arg0: i32, %arg1: i32, %arg2: memref<1x8x2x128xf32, #tpu.memory_space<vmem>>, %arg3: memref<1x1x2x128xi32, #tpu.memory_space<vmem>>, %arg4: memref<1x1x2x128xf32, #tpu.memory_space<vmem>>, %arg5: memref<1x1x1xf32, #tpu.memory_space<vmem>>, %arg6: memref<1x1x1xf32, #tpu.memory_space<vmem>>, %arg7: memref<2x128xf32, #tpu.memory_space<vmem>>, %arg8: memref<2x128xf32, #tpu.memory_space<vmem>>) attributes {dimension_semantics = [#tpu.dimension_semantics<parallel>, #tpu.dimension_semantics<arbitrary>], iteration_bounds = array<i64: 2, 1>, scalar_prefetch = 0 : i64, scratch_operands = 2 : i64, tpu.core_type = #tpu.core_type<tc>, window_params = [{transform_indices = @transform_0, window_bounds = array<i64: 1, 8, 2, 128>}, {transform_indices = @transform_1, window_bounds = array<i64: 1, 1, 2, 128>}, {transform_indices = @transform_2, window_bounds = array<i64: 1, 1, 2, 128>}, {transform_indices = @transform_3, window_bounds = array<i64: 1, 1, 1>}, {transform_indices = @transform_4, window_bounds = array<i64: 1, 1, 1>}]} {
    %c0_i32 = arith.constant 0 : i32
    %0 = arith.cmpi eq, %arg1, %c0_i32 : i32
    %1 = arith.extui %0 : i1 to i32
    %c0_i32_0 = arith.constant 0 : i32
    %2 = arith.cmpi ne, %1, %c0_i32_0 : i32
    scf.if %2 {
      %cst_67 = arith.constant 0.000000e+00 : f32
      %92 = vector.broadcast %cst_67 : f32 to vector<2x128xf32>
      %c0_68 = arith.constant 0 : index
      %c0_69 = arith.constant 0 : index
      %93 = vector.load %arg7[%c0_68, %c0_69] : memref<2x128xf32, #tpu.memory_space<vmem>>, vector<2x128xf32>
      tpu.vector_store %arg7[%c0_68, %c0_69], %92 {strides = array<i32>} : memref<2x128xf32, #tpu.memory_space<vmem>>, vector<2x128xf32>,
      %cst_70 = arith.constant 0.000000e+00 : f32
      %94 = vector.broadcast %cst_70 : f32 to vector<2x128xf32>
      %c0_71 = arith.constant 0 : index
      %c0_72 = arith.constant 0 : index
      %95 = vector.load %arg8[%c0_71, %c0_72] : memref<2x128xf32, #tpu.memory_space<vmem>>, vector<2x128xf32>
      tpu.vector_store %arg8[%c0_71, %c0_72], %94 {strides = array<i32>} : memref<2x128xf32, #tpu.memory_space<vmem>>, vector<2x128xf32>,
    } else {
    }
    %c0 = arith.constant 0 : index
    %c0_1 = arith.constant 0 : index
    %c0_2 = arith.constant 0 : index
    %c0_3 = arith.constant 0 : index
    %3 = vector.load %arg3[%c0, %c0_1, %c0_2, %c0_3] : memref<1x1x2x128xi32, #tpu.memory_space<vmem>>, vector<1x1x2x128xi32>
    %4 = vector.shape_cast %3 : vector<1x1x2x128xi32> to vector<2x128xi32>
    %c0_4 = arith.constant 0 : index
    %c0_5 = arith.constant 0 : index
    %c0_6 = arith.constant 0 : index
    %c0_7 = arith.constant 0 : index
    %5 = vector.load %arg4[%c0_4, %c0_5, %c0_6, %c0_7] : memref<1x1x2x128xf32, #tpu.memory_space<vmem>>, vector<1x1x2x128xf32>
    %6 = vector.shape_cast %5 : vector<1x1x2x128xf32> to vector<2x128xf32>
    %c0_i32_8 = arith.constant 0 : i32
    %7 = vector.broadcast %c0_i32_8 : i32 to vector<2x128xi32>
    %8 = arith.cmpi sge, %4, %7 : vector<2x128xi32>
    %c0_i32_9 = arith.constant 0 : i32
    %9 = vector.broadcast %c0_i32_9 : i32 to vector<2x128xi32>
    %10 = arith.select %8, %4, %9 : vector<2x128xi1>, vector<2x128xi32>
    %c0_10 = arith.constant 0 : index
    %c0_11 = arith.constant 0 : index
    %c0_12 = arith.constant 0 : index
    %c0_13 = arith.constant 0 : index
    %11 = vector.load %arg2[%c0_10, %c0_11, %c0_12, %c0_13] : memref<1x8x2x128xf32, #tpu.memory_space<vmem>>, vector<1x1x2x128xf32>
    %12 = vector.shape_cast %11 : vector<1x1x2x128xf32> to vector<2x128xf32>
    %c0_14 = arith.constant 0 : index
    %c1 = arith.constant 1 : index
    %c0_15 = arith.constant 0 : index
    %c0_16 = arith.constant 0 : index
    %13 = vector.load %arg2[%c0_14, %c1, %c0_15, %c0_16] : memref<1x8x2x128xf32, #tpu.memory_space<vmem>>, vector<1x1x2x128xf32>
    %14 = vector.shape_cast %13 : vector<1x1x2x128xf32> to vector<2x128xf32>
    %15 = arith.maximumf %12, %14 : vector<2x128xf32>
    %c0_17 = arith.constant 0 : index
    %c2 = arith.constant 2 : index
    %c0_18 = arith.constant 0 : index
    %c0_19 = arith.constant 0 : index
    %16 = vector.load %arg2[%c0_17, %c2, %c0_18, %c0_19] : memref<1x8x2x128xf32, #tpu.memory_space<vmem>>, vector<1x1x2x128xf32>
    %17 = vector.shape_cast %16 : vector<1x1x2x128xf32> to vector<2x128xf32>
    %18 = arith.maximumf %15, %17 : vector<2x128xf32>
    %c0_20 = arith.constant 0 : index
    %c3 = arith.constant 3 : index
    %c0_21 = arith.constant 0 : index
    %c0_22 = arith.constant 0 : index
    %19 = vector.load %arg2[%c0_20, %c3, %c0_21, %c0_22] : memref<1x8x2x128xf32, #tpu.memory_space<vmem>>, vector<1x1x2x128xf32>
    %20 = vector.shape_cast %19 : vector<1x1x2x128xf32> to vector<2x128xf32>
    %21 = arith.maximumf %18, %20 : vector<2x128xf32>
    %cst = arith.constant 0.000000e+00 : f32
    %22 = vector.broadcast %cst : f32 to vector<2x128xf32>
    %cst_23 = arith.constant 0.000000e+00 : f32
    %23 = vector.broadcast %cst_23 : f32 to vector<2x128xf32>
    %cst_24 = arith.constant 0.000000e+00 : f32
    %24 = vector.broadcast %cst_24 : f32 to vector<2x128xf32>
    %c0_25 = arith.constant 0 : index
    %c0_26 = arith.constant 0 : index
    %c0_27 = arith.constant 0 : index
    %c0_28 = arith.constant 0 : index
    %25 = vector.load %arg2[%c0_25, %c0_26, %c0_27, %c0_28] : memref<1x8x2x128xf32, #tpu.memory_space<vmem>>, vector<1x1x2x128xf32>
    %26 = vector.shape_cast %25 : vector<1x1x2x128xf32> to vector<2x128xf32>
    %27 = arith.subf %26, %21 : vector<2x128xf32>
    %28 = math.exp %27 : vector<2x128xf32>
    %29 = arith.addf %22, %28 : vector<2x128xf32>
    %c0_i32_29 = arith.constant 0 : i32
    %30 = vector.broadcast %c0_i32_29 : i32 to vector<2x128xi32>
    %31 = arith.cmpi eq, %10, %30 : vector<2x128xi32>
    %32 = arith.select %31, %26, %23 : vector<2x128xi1>, vector<2x128xf32>
    %c0_30 = arith.constant 0 : index
    %c4 = arith.constant 4 : index
    %c0_31 = arith.constant 0 : index
    %c0_32 = arith.constant 0 : index
    %33 = vector.load %arg2[%c0_30, %c4, %c0_31, %c0_32] : memref<1x8x2x128xf32, #tpu.memory_space<vmem>>, vector<1x1x2x128xf32>
    %34 = vector.shape_cast %33 : vector<1x1x2x128xf32> to vector<2x128xf32>
    %35 = arith.select %31, %34, %24 : vector<2x128xi1>, vector<2x128xf32>
    %c0_33 = arith.constant 0 : index
    %c1_34 = arith.constant 1 : index
    %c0_35 = arith.constant 0 : index
    %c0_36 = arith.constant 0 : index
    %36 = vector.load %arg2[%c0_33, %c1_34, %c0_35, %c0_36] : memref<1x8x2x128xf32, #tpu.memory_space<vmem>>, vector<1x1x2x128xf32>
    %37 = vector.shape_cast %36 : vector<1x1x2x128xf32> to vector<2x128xf32>
    %38 = arith.subf %37, %21 : vector<2x128xf32>
    %39 = math.exp %38 : vector<2x128xf32>
    %40 = arith.addf %29, %39 : vector<2x128xf32>
    %c1_i32 = arith.constant 1 : i32
    %41 = vector.broadcast %c1_i32 : i32 to vector<2x128xi32>
    %42 = arith.cmpi eq, %10, %41 : vector<2x128xi32>
    %43 = arith.select %42, %37, %32 : vector<2x128xi1>, vector<2x128xf32>
    %c0_37 = arith.constant 0 : index
    %c5 = arith.constant 5 : index
    %c0_38 = arith.constant 0 : index
    %c0_39 = arith.constant 0 : index
    %44 = vector.load %arg2[%c0_37, %c5, %c0_38, %c0_39] : memref<1x8x2x128xf32, #tpu.memory_space<vmem>>, vector<1x1x2x128xf32>
    %45 = vector.shape_cast %44 : vector<1x1x2x128xf32> to vector<2x128xf32>
    %46 = arith.select %42, %45, %35 : vector<2x128xi1>, vector<2x128xf32>
    %c0_40 = arith.constant 0 : index
    %c2_41 = arith.constant 2 : index
    %c0_42 = arith.constant 0 : index
    %c0_43 = arith.constant 0 : index
    %47 = vector.load %arg2[%c0_40, %c2_41, %c0_42, %c0_43] : memref<1x8x2x128xf32, #tpu.memory_space<vmem>>, vector<1x1x2x128xf32>
    %48 = vector.shape_cast %47 : vector<1x1x2x128xf32> to vector<2x128xf32>
    %49 = arith.subf %48, %21 : vector<2x128xf32>
    %50 = math.exp %49 : vector<2x128xf32>
    %51 = arith.addf %40, %50 : vector<2x128xf32>
    %c2_i32 = arith.constant 2 : i32
    %52 = vector.broadcast %c2_i32 : i32 to vector<2x128xi32>
    %53 = arith.cmpi eq, %10, %52 : vector<2x128xi32>
    %54 = arith.select %53, %48, %43 : vector<2x128xi1>, vector<2x128xf32>
    %c0_44 = arith.constant 0 : index
    %c6 = arith.constant 6 : index
    %c0_45 = arith.constant 0 : index
    %c0_46 = arith.constant 0 : index
    %55 = vector.load %arg2[%c0_44, %c6, %c0_45, %c0_46] : memref<1x8x2x128xf32, #tpu.memory_space<vmem>>, vector<1x1x2x128xf32>
    %56 = vector.shape_cast %55 : vector<1x1x2x128xf32> to vector<2x128xf32>
    %57 = arith.select %53, %56, %46 : vector<2x128xi1>, vector<2x128xf32>
    %c0_47 = arith.constant 0 : index
    %c3_48 = arith.constant 3 : index
    %c0_49 = arith.constant 0 : index
    %c0_50 = arith.constant 0 : index
    %58 = vector.load %arg2[%c0_47, %c3_48, %c0_49, %c0_50] : memref<1x8x2x128xf32, #tpu.memory_space<vmem>>, vector<1x1x2x128xf32>
    %59 = vector.shape_cast %58 : vector<1x1x2x128xf32> to vector<2x128xf32>
    %60 = arith.subf %59, %21 : vector<2x128xf32>
    %61 = math.exp %60 : vector<2x128xf32>
    %62 = arith.addf %51, %61 : vector<2x128xf32>
    %c3_i32 = arith.constant 3 : i32
    %63 = vector.broadcast %c3_i32 : i32 to vector<2x128xi32>
    %64 = arith.cmpi eq, %10, %63 : vector<2x128xi32>
    %65 = arith.select %64, %59, %54 : vector<2x128xi1>, vector<2x128xf32>
    %c0_51 = arith.constant 0 : index
    %c7 = arith.constant 7 : index
    %c0_52 = arith.constant 0 : index
    %c0_53 = arith.constant 0 : index
    %66 = vector.load %arg2[%c0_51, %c7, %c0_52, %c0_53] : memref<1x8x2x128xf32, #tpu.memory_space<vmem>>, vector<1x1x2x128xf32>
    %67 = vector.shape_cast %66 : vector<1x1x2x128xf32> to vector<2x128xf32>
    %68 = arith.select %64, %67, %57 : vector<2x128xi1>, vector<2x128xf32>
    %69 = math.log %62 : vector<2x128xf32>
    %70 = arith.addf %21, %69 : vector<2x128xf32>
    %71 = arith.subf %70, %65 : vector<2x128xf32>
    %cst_54 = arith.constant 0.000000e+00 : f32
    %72 = vector.broadcast %cst_54 : f32 to vector<2x128xf32>
    %73 = arith.select %8, %71, %72 : vector<2x128xi1>, vector<2x128xf32>
    %74 = arith.subf %68, %6 : vector<2x128xf32>
    %cst_55 = arith.constant 0.000000e+00 : f32
    %75 = vector.broadcast %cst_55 : f32 to vector<2x128xf32>
    %76 = arith.select %8, %74, %75 : vector<2x128xi1>, vector<2x128xf32>
    %c0_56 = arith.constant 0 : index
    %c0_57 = arith.constant 0 : index
    %77 = vector.load %arg7[%c0_56, %c0_57] : memref<2x128xf32, #tpu.memory_space<vmem>>, vector<2x128xf32>
    %cst_58 = arith.constant 1.000000e+01 : f32
    %78 = vector.broadcast %cst_58 : f32 to vector<2x128xf32>
    %79 = arith.mulf %78, %76 : vector<2x128xf32>
    %80 = arith.mulf %79, %76 : vector<2x128xf32>
    %81 = arith.addf %73, %80 : vector<2x128xf32>
    %82 = arith.addf %77, %81 : vector<2x128xf32>
    %c0_59 = arith.constant 0 : index
    %c0_60 = arith.constant 0 : index
    %83 = vector.load %arg7[%c0_59, %c0_60] : memref<2x128xf32, #tpu.memory_space<vmem>>, vector<2x128xf32>
    tpu.vector_store %arg7[%c0_59, %c0_60], %82 {strides = array<i32>} : memref<2x128xf32, #tpu.memory_space<vmem>>, vector<2x128xf32>,
    %c0_61 = arith.constant 0 : index
    %c0_62 = arith.constant 0 : index
    %84 = vector.load %arg8[%c0_61, %c0_62] : memref<2x128xf32, #tpu.memory_space<vmem>>, vector<2x128xf32>
    %85 = arith.extui %8 : vector<2x128xi1> to vector<2x128xi32>
    %86 = arith.sitofp %85 : vector<2x128xi32> to vector<2x128xf32>
    %87 = arith.addf %84, %86 : vector<2x128xf32>
    %c0_63 = arith.constant 0 : index
    %c0_64 = arith.constant 0 : index
    %88 = vector.load %arg8[%c0_63, %c0_64] : memref<2x128xf32, #tpu.memory_space<vmem>>, vector<2x128xf32>
    tpu.vector_store %arg8[%c0_63, %c0_64], %87 {strides = array<i32>} : memref<2x128xf32, #tpu.memory_space<vmem>>, vector<2x128xf32>,
    %c0_i32_65 = arith.constant 0 : i32
    %89 = arith.cmpi eq, %arg1, %c0_i32_65 : i32
    %90 = arith.extui %89 : i1 to i32
    %c0_i32_66 = arith.constant 0 : i32
    %91 = arith.cmpi ne, %90, %c0_i32_66 : i32
    scf.if %91 {
      %c0_67 = arith.constant 0 : index
      %c0_68 = arith.constant 0 : index
      %92 = vector.load %arg7[%c0_67, %c0_68] : memref<2x128xf32, #tpu.memory_space<vmem>>, vector<2x128xf32>
      %93 = vector.shape_cast %92 : vector<2x128xf32> to vector<1x2x128xf32>
      %cst_69 = arith.constant dense<0.000000e+00> : vector<1xf32>
      %94 = vector.multi_reduction <add>, %93, %cst_69 [1, 2] : vector<1x2x128xf32> to vector<1xf32>
      %95 = vector.shape_cast %94 : vector<1xf32> to vector<1x1x1xf32>
      %96 = vector.extract %95[0, 0, 0] : f32 from vector<1x1x1xf32>
      %97 = vector.broadcast %96 : f32 to vector<1x1xf32>
      %98 = vector.shape_cast %97 : vector<1x1xf32> to vector<1x1x1xf32>
      %c0_70 = arith.constant 0 : index
      %c0_71 = arith.constant 0 : index
      %c0_72 = arith.constant 0 : index
      %99 = vector.load %arg5[%c0_70, %c0_71, %c0_72] : memref<1x1x1xf32, #tpu.memory_space<vmem>>, vector<1x1x1xf32>
      tpu.vector_store %arg5[%c0_70, %c0_71, %c0_72], %98 {strides = array<i32>} : memref<1x1x1xf32, #tpu.memory_space<vmem>>, vector<1x1x1xf32>,
      %c0_73 = arith.constant 0 : index
      %c0_74 = arith.constant 0 : index
      %100 = vector.load %arg8[%c0_73, %c0_74] : memref<2x128xf32, #tpu.memory_space<vmem>>, vector<2x128xf32>
      %101 = vector.shape_cast %100 : vector<2x128xf32> to vector<1x2x128xf32>
      %cst_75 = arith.constant dense<0.000000e+00> : vector<1xf32>
      %102 = vector.multi_reduction <add>, %101, %cst_75 [1, 2] : vector<1x2x128xf32> to vector<1xf32>
      %103 = vector.shape_cast %102 : vector<1xf32> to vector<1x1x1xf32>
      %104 = vector.extract %103[0, 0, 0] : f32 from vector<1x1x1xf32>
      %105 = vector.broadcast %104 : f32 to vector<1x1xf32>
      %106 = vector.shape_cast %105 : vector<1x1xf32> to vector<1x1x1xf32>
      %c0_76 = arith.constant 0 : index
      %c0_77 = arith.constant 0 : index
      %c0_78 = arith.constant 0 : index
      %107 = vector.load %arg6[%c0_76, %c0_77, %c0_78] : memref<1x1x1xf32, #tpu.memory_space<vmem>>, vector<1x1x1xf32>
      tpu.vector_store %arg6[%c0_76, %c0_77, %c0_78], %106 {strides = array<i32>} : memref<1x1x1xf32, #tpu.memory_space<vmem>>, vector<1x1x1xf32>,
    } else {
    }
    return
  }
  func.func @transform_0(%arg0: i32, %arg1: i32) -> (i32, i32, i32, i32) {
    %c0_i32 = arith.constant 0 : i32
    %c0_i32_0 = arith.constant 0 : i32
    %c0_i32_1 = arith.constant 0 : i32
    return %arg0, %c0_i32, %arg1, %c0_i32_0 : i32, i32, i32, i32
  }
  func.func @transform_1(%arg0: i32, %arg1: i32) -> (i32, i32, i32, i32) {
    %c0_i32 = arith.constant 0 : i32
    %c0_i32_0 = arith.constant 0 : i32
    %c0_i32_1 = arith.constant 0 : i32
    return %arg0, %c0_i32, %arg1, %c0_i32_0 : i32, i32, i32, i32
  }
  func.func @transform_2(%arg0: i32, %arg1: i32) -> (i32, i32, i32, i32) {
    %c0_i32 = arith.constant 0 : i32
    %c0_i32_0 = arith.constant 0 : i32
    %c0_i32_1 = arith.constant 0 : i32
    return %arg0, %c0_i32, %arg1, %c0_i32_0 : i32, i32, i32, i32
  }
  func.func @transform_3(%arg0: i32, %arg1: i32) -> (i32, i32, i32) {
    %c0_i32 = arith.constant 0 : i32
    %c0_i32_0 = arith.constant 0 : i32
    %c0_i32_1 = arith.constant 0 : i32
    return %arg0, %c0_i32, %c0_i32_0 : i32, i32, i32
  }
  func.func @transform_4(%arg0: i32, %arg1: i32) -> (i32, i32, i32) {
    %c0_i32 = arith.constant 0 : i32
    %c0_i32_0 = arith.constant 0 : i32
    %c0_i32_1 = arith.constant 0 : i32
    return %arg0, %c0_i32, %c0_i32_0 : i32, i32, i32
  }
}

</mosaic_0001>

<bundles_post_ra>
// kernel: bin_loss.1
= control target key start
LH: loop header
LB: loop body
LE: loop exit
PB: predicated region body
PF: predicated region fallthrough
CT: control target
= control target key end

     0   :  { %s612_s15 = smov 0   ;;  %s614_s16 = smov 0   ;;  %s686_s0 = inlined_call_operand.vmem [shape: f32[2,8,2,128], index: 0, kind: input, shape index: {}]   ;;  %s687_s1 = inlined_call_operand.vmem [shape: s32[2,1,2,128], index: 1, kind: input, shape index: {}]   ;;  %s688_s2 = inlined_call_operand.vmem [shape: f32[2,1,2,128], index: 2, kind: input, shape index: {}]   ;;  %s689_s3 = inlined_call_operand.vmem [shape: f32[2,1,1], index: 3, kind: output, shape index: {0}]   ;;  %s690_s4 = inlined_call_operand.vmem [shape: f32[2,1,1], index: 4, kind: output, shape index: {1}]  }
   0x1   :  { %s616_s17 = smov 0  }
   0x2 LB: > { %s27_s18 = sadd.s32 1, %s580_s16  ;;  %p507_p0 = scmp.ge.s32.totalorder %s584_s17, 1  ;;  %s584_s17 = sphi %s616_s17, %s15_s17   ;;  %s580_s16 = sphi %s614_s16, %s692_s16   ;;  %s576_s15 = sphi %s612_s15, %s691_s15  }
   0x3   : > { %p29_p1 = scmp.ge.s32.totalorder %s27_s18, 2  ;;  %p210_p2 = scmp.lt.s32.totalorder %s584_s17, 3 }
   0x5   : > { %s694_s18 = smov (%p29_p1, %s27_s18), 0  ;;  %p211_p3 = pnand %p507_p0, %p210_p2 }
   0x6   : > { %p254_p4 = scmp.lt.s32.totalorder (!%p211_p3), %s576_s15, 1 }
   0x7   : > { %214 = sbr.rel (%p211_p3) target bundleno = 256 (0x100), region = 32 }
   0xc   : > { %v586_v0 = vmov 0.0   ;;  %s696_s15 = smov (!%p254_p4, %s576_s15), 1  ;;  %vm360_vm5 = vcmask 1041408   ;;  %vm372_vm6 = vcmask 0  }
   0xd   : > { %286 = vst [vmem:[#allocation2] sm:$0x3] %v586_v0  ;;  %s522_s19 = sshll.u32 %s696_s15, 4  ;;  %s510_s20 = sshll.u32 %s696_s15, 1 }
   0xe   : > { %287 = vst [vmem:[#allocation3] sm:$0x3] %v586_v0  ;;  %s637_s23 = scalar_lea.vmem %s686_s0, %s522_s19  ;;  %s268_s26 = scalar_lea.vmem %s687_s1, %s510_s20 }
   0xf   : > { %v288_v1 = vld [vmem:[%s268_s26] sm:$0x3]  ;;  %v512_v3 = vld [vmem:[%s637_s23 + $0x2] sm:$0x3]  ;;  %v513_v5 = vld [vmem:[%s637_s23 + $0x4] sm:$0x3]  ;;  %s275_s29 = scalar_lea.vmem %s688_s2, %s510_s20  ;;  %s278_s6 = scalar_lea.vmem %s689_s3, %s696_s15 }
  0x10   : > { %v292_v2 = vld [vmem:[%s637_s23] sm:$0x3]  ;;  %vm290_vm0 = vcmp.ge.s32.totalorder %v288_v1, 0  ;;  %v514_v6 = vld [vmem:[%s637_s23 + $0x6] sm:$0x3]  ;;  %s281_s10 = scalar_lea.vmem %s690_s4, %s696_s15 }
  0x11   : > { %v295_v4 = vmax.f32 %v292_v2, %v512_v3  ;;  %v291_v8 = vsel %vm290_vm0, %v288_v1, 0  ;;  %v515_v14 = vld [vmem:[%s637_s23 + $0x8] sm:$0x3]  ;;  %v516_v20 = vld [vmem:[%s637_s23 + $0xa] sm:$0x3]  ;;  %v519_v24 = vsel %vm290_vm0, 1.0, %v586_v0 }
  0x12   : > { %vm306_vm1 = vcmp.eq.s32.totalorder %v291_v8, 0  ;;  %vm315_vm2 = vcmp.eq.s32.totalorder %v291_v8, 1  ;;  %vm324_vm3 = vcmp.eq.s32.totalorder %v291_v8, 2  ;;  %v517_v22 = vld [vmem:[%s637_s23 + $0xc] sm:$0x3]  ;;  %vm333_vm4 = vcmp.eq.s32.totalorder %v291_v8, 3 }
  0x13   : > { %v298_v7 = vmax.f32 %v295_v4, %v513_v5  ;;  %v310_v19 = vsel %vm306_vm1, %v515_v14, 0.0  ;;  %v518_v29 = vld [vmem:[%s637_s23 + $0xe] sm:$0x3]  ;;  %v289_v33 = vld [vmem:[%s275_s29] sm:$0x3]  ;;  %v307_v37 = vsel %vm306_vm1, %v292_v2, 0.0 }
  0x14   : > { %v319_v21 = vsel %vm315_vm2, %v516_v20, %v310_v19  ;;  %v316_v39 = vsel %vm315_vm2, %v512_v3, %v307_v37  ;;  %v345_v50 = vld [vmem:[#allocation2] sm:$0x3] }
  0x15   : > { %v301_v9 = vmax.f32 %v298_v7, %v514_v6  ;;  %v351_v23 = vld [vmem:[#allocation3] sm:$0x3]  ;;  %v328_v28 = vsel %vm324_vm3, %v517_v22, %v319_v21  ;;  %v325_v41 = vsel %vm324_vm3, %v513_v5, %v316_v39 }
  0x16   : > { %v354_v26 = vadd.f32 %v519_v24, %v351_v23  ;;  %v337_v35 = vsel %vm333_vm4, %v518_v29, %v328_v28  ;;  %v334_v45 = vsel %vm333_vm4, %v514_v6, %v325_v41 }
  0x17   : > { %v302_v10 = vsub.f32 %v292_v2, %v301_v9  ;;  %v311_v11 = vsub.f32 %v512_v3, %v301_v9  ;;  %v320_v12 = vsub.f32 %v513_v5, %v301_v9  ;;  %v329_v13 = vsub.f32 %v514_v6, %v301_v9 }
  0x18   : > { %355 = vst [vmem:[#allocation3] sm:$0x3] %v354_v26  ;;  %v343_v38 = vsub.f32 %v337_v35, %v289_v33 }
  0x19   : > { %v303_v15 = vmul.f32 1.442695, %v302_v10  ;;  %v312_v16 = vmul.f32 1.442695, %v311_v11  ;;  %v321_v17 = vmul.f32 1.442695, %v320_v12 }
  0x1a   : > { %v330_v18 = vmul.f32 1.442695, %v329_v13  ;;  %v344_v40 = vsel %vm290_vm0, %v343_v38, 0.0 }
  0x1b   : > { %552 = vpow2.f32 %v303_v15  ;;  %v346_v43 = vmul.f32 10.0, %v344_v40 }
  0x1c   : > { %554 = vpow2.f32 %v312_v16 }
  0x1d   : > { %556 = vpow2.f32 %v321_v17  ;;  %v347_v47 = vmul.f32 %v346_v43, %v344_v40 }
  0x1e   : > { %558 = vpow2.f32 %v330_v18 }
  0x1f   : > { %v374_v55 = vld [vmem:[#allocation3] sm:$0x3] }
  0x20   : > { %v375_v56 = vsel %vm360_vm5, %v374_v55, 0.0 }
  0x21   : > { %v553_v25 = vpop.eup %552 }
  0x22   : > { %v555_v27 = vpop.eup %554 }
  0x23   : > { %v557_v30 = vpop.eup %556  ;;  %v314_v31 = vadd.f32 %v555_v27, %v553_v25 }
  0x24   : > { %v559_v32 = vpop.eup %558 }
  0x25   : > { %v323_v34 = vadd.f32 %v557_v30, %v314_v31 }
  0x27   : > { %v332_v36 = vadd.f32 %v559_v32, %v323_v34 }
  0x29   : > { %560 = vlog2.f32 %v332_v36 }
  0x2f   : > { %v561_v42 = vpop.eup %560 }
  0x30   : > { %v339_v44 = vmul.f32 0.6931472, %v561_v42 }
  0x32   : > { %v340_v46 = vadd.f32 %v339_v44, %v301_v9 }
  0x34   : > { %v341_v48 = vsub.f32 %v340_v46, %v334_v45 }
  0x36   : > { %v342_v49 = vsel %vm290_vm0, %v341_v48, 0.0 }
  0x37   : > { %v348_v51 = vadd.f32 %v347_v47, %v342_v49 }
  0x39   : > { %v349_v52 = vadd.f32 %v348_v51, %v345_v50 }
  0x3b   : > { %350 = vst [vmem:[#allocation2] sm:$0x3] %v349_v52 }
  0x42   : > { %v359_v53 = vld [vmem:[#allocation2] sm:$0x3] }
  0x43   : > { %v361_v54 = vsel %vm360_vm5, %v359_v53, 0.0 }
  0x44   : > { %362 = vadd.xlane.f32.xlu0 %v361_v54 }
  0x4c   : > { %376 = vadd.xlane.f32.xlu0 %v375_v56 }
  0xb7   : > { %v363_v57 = vpop.xlane.xlu0 %362 }
  0xb8   : > { %v364_v58 = vrot.slane %v363_v57, 4 }
  0xba   : > { %v365_v59 = vadd.f32 %v364_v58, %v363_v57 }
  0xbc   : > { %v366_v60 = vrot.slane %v365_v59, 2 }
  0xbe   : > { %v367_v61 = vadd.f32 %v366_v60, %v365_v59 }
  0xbf   : > { %v377_v62 = vpop.xlane.xlu0 %376 }
  0xc0   : > { %v378_v63 = vrot.slane %v377_v62, 4  ;;  %v368_v0 = vrot.slane %v367_v61, 1 }
  0xc2   : > { %v379_v1 = vadd.f32 %v378_v63, %v377_v62  ;;  %v369_v2 = vadd.f32 %v368_v0, %v367_v61 }
  0xc4   : > { %v380_v3 = vrot.slane %v379_v1, 2  ;;  %523 = vpush %v369_v2 }
  0xc6   : > { %v381_v4 = vadd.f32 %v380_v3, %v379_v1 }
  0xc8   : > { %v382_v5 = vrot.slane %v381_v4, 1 }
  0xca   : > { %v383_v6 = vadd.f32 %v382_v5, %v381_v4 }
  0xcc   : > { %525 = vpush %v383_v6 }
  0xf5   : > { %s524_s7 = spop %523 }
  0xf6   : > { %v371_v7 = vstv %s524_s7 }
  0xf7   : > { %373 = vst.msk [vmem:[%s278_s6] sm:$0x1] %vm372_vm6, %v371_v7 }
  0xfd   : > { %s526_s11 = spop %525 }
  0xfe   : > { %v385_v8 = vstv %s526_s11 }
  0xff   : > { %386 = vst.msk [vmem:[%s281_s10] sm:$0x1] %vm372_vm6, %v385_v8 }
 0x100 PF: > { %s15_s17 = sadd.s32 1, %s584_s17   ;;  %s691_s15 = smov %s580_s16 }
 0x101   : > { %p12_p5 = scmp.ge.s32.totalorder %s15_s17, 4   ;;  %s692_s16 = smov %s694_s18 }
 0x103   :  { %14 = sbr.rel (!%p12_p5) target bundleno = 2 (0x2), region = 95 }

</bundles_post_ra>
